<compile_context>
chip_gen: v7x
topology: tpu7x:2x2x1
jax: 0.10.0
libtpu: 0.0.40
codegen_flags: <defaults>
</compile_context>

<pallas_src>
import functools

import jax
import jax.numpy as jnp
from jax.experimental import pallas as pl
from jax.experimental.pallas import tpu as pltpu

NEG_SLOPE = 0.1            # nn.LeakyReLU(0.1) in the WRN BasicBlock
BN_EPS = 1e-5              # PyTorch BatchNorm2d default


def _lrelu(y):
    return jnp.where(y >= 0, y, NEG_SLOPE * y)


# ============================================================================= VMEM / pipeline cfg
@functools.lru_cache(maxsize=None)
def _vmem_limit_bytes():
    """Per-generation scoped VMEM limit: ~100 MiB on 128-MiB parts (v5e/v6e), ~56 MiB on v7x."""
    try:
        cap = int(pltpu.get_tpu_info().vmem_capacity_bytes)
    except Exception:                      # conservative fallback (fits every generation)
        cap = 64 * 1024 * 1024
    return min(cap - 8 * 1024 * 1024, 100 * 1024 * 1024)


@functools.lru_cache(maxsize=None)
def _weight_pipeline_mode():
    """Single-buffer mode for grid-constant inputs (weights / BN vectors), if supported.

    These blocks never change across the batch grid, but default double-buffering still keeps two
    resident copies — the VMEM blow-up flagged for WRN-scale channel counts on v7x.  Probe once
    with a trivial kernel; fall back to the default pipeline mode if Buffered(1) is unavailable.
    """
    def _probe(x_ref, o_ref):
        o_ref[...] = x_ref[...] * 2.0

    try:
        mode = pl.Buffered(1)
        fn = pl.pallas_call(
            _probe,
            out_shape=jax.ShapeDtypeStruct((8, 128), jnp.float32),
            grid=(2,),
            in_specs=[pl.BlockSpec((8, 128), lambda i: (0, 0), pipeline_mode=mode)],
            out_specs=pl.BlockSpec((8, 128), lambda i: (0, 0)),
        )
        jax.block_until_ready(fn(jnp.ones((8, 128), jnp.float32)))
        return mode
    except Exception:
        return None


def _const_spec(block_shape):
    """BlockSpec for an input whose block never changes across the (batch) grid."""
    nd = len(block_shape)
    index_map = lambda i: (0,) * nd
    mode = _weight_pipeline_mode()
    if mode is None:
        return pl.BlockSpec(block_shape, index_map)
    return pl.BlockSpec(block_shape, index_map, pipeline_mode=mode)


# ============================================================================= in-kernel helpers
def _zero_halo(pad_ref):
    """Zero only the 1-pixel halo of a padded scratch (the interior is rewritten every step)."""
    Hp, Wp, C = pad_ref.shape
    z_row = jnp.zeros((1, Wp, C), pad_ref.dtype)
    z_col = jnp.zeros((Hp, 1, C), pad_ref.dtype)
    pad_ref[0:1, :, :] = z_row
    pad_ref[Hp - 1:Hp, :, :] = z_row
    pad_ref[:, 0:1, :] = z_col
    pad_ref[:, Wp - 1:Wp, :] = z_col


def _accum_3x3_taps(pad_ref, w_ref, H, W, acc):
    """acc (H*W, Cout) f32 (+)= sum_{kh,kw} window(pad, kh, kw) @ w[kh, kw]  (bf16 x bf16 -> f32).

    The kw sublane shift is hoisted: one shifted slab per kw (3 slice+reshape copies per conv
    instead of 9); each kh tap is a sublane-aligned row slice of the flattened slab.  If acc is
    None the first tap's dot seeds the accumulator (no zeros+add pass).
    """
    Hp, _, C = pad_ref.shape
    for kw in range(3):
        slab = pad_ref[:, kw:kw + W, :].reshape(Hp * W, C)
        for kh in range(3):
            win = slab[kh * W:kh * W + H * W, :].astype(jnp.bfloat16)
            d = jnp.dot(win, w_ref[kh, kw], preferred_element_type=jnp.float32)
            acc = d if acc is None else acc + d
    return acc


# ============================================================================= kernels
def _make_stride1_block_kernel(equal: bool, apply_bn1: bool):
    """Fully fused pre-activation BasicBlock, stride 1.

    bn1+LeakyReLU -> conv1 (3x3, 9 in-VMEM taps, bn2 scale folded) -> +shift, LeakyReLU ->
    conv2 (3x3 taps) -> (+ residual / 1x1 shortcut).  All intermediates stay in VMEM scratch;
    matmul operands are bf16, accumulation and epilogues f32.
    """

    def body(x_ref, w1_ref, w2_ref, ws_ref, s1_ref, b1_ref, b2_ref, o_ref, a_pad, h_pad):
        _, H, W, Cin = x_ref.shape
        Cout = o_ref.shape[3]

        x = x_ref[0]                                            # (H, W, Cin) f32
        if apply_bn1:
            a = _lrelu(x * s1_ref[...] + b1_ref[...])           # relu1(bn1(x)), f32
        else:
            a = x                                               # PyTorch quirk: bn1 output unused

        # conv1 taps read a zero-halo padded scratch; only the halo is (re)zeroed each step.
        _zero_halo(a_pad)
        a_pad[1:H + 1, 1:W + 1, :] = a

        # conv1 (3x3, stride 1) with bn2's scale folded into the bf16 weights.
        acc1 = _accum_3x3_taps(a_pad, w1_ref, H, W, None)
        h1 = _lrelu(acc1 + b2_ref[...])                         # + bn2 shift, LeakyReLU (f32)

        _zero_halo(h_pad)
        h_pad[1:H + 1, 1:W + 1, :] = h1.reshape(H, W, Cout)

        # residual / 1x1 shortcut seeds the conv2 accumulator.
        if equal:
            acc2 = x.reshape(H * W, Cin)                        # identity shortcut, f32
        else:
            acc2 = jnp.dot(a.reshape(H * W, Cin).astype(jnp.bfloat16), ws_ref[...],
                           preferred_element_type=jnp.float32)
        acc2 = _accum_3x3_taps(h_pad, w2_ref, H, W, acc2)

        o_ref[...] = acc2.reshape(1, H, W, Cout).astype(o_ref.dtype)

    if equal:
        def kernel(x_ref, w1_ref, w2_ref, s1_ref, b1_ref, b2_ref, o_ref, a_pad, h_pad):
            body(x_ref, w1_ref, w2_ref, None, s1_ref, b1_ref, b2_ref, o_ref, a_pad, h_pad)
    else:
        def kernel(x_ref, w1_ref, w2_ref, ws_ref, s1_ref, b1_ref, b2_ref, o_ref, a_pad, h_pad):
            body(x_ref, w1_ref, w2_ref, ws_ref, s1_ref, b1_ref, b2_ref, o_ref, a_pad, h_pad)
    return kernel


def _transition_block_kernel(p_ref, w1_ref, b2_ref, w2_ref, src_ref, ws_ref, o_ref, h_pad):
    """Stride-s stage-transition block: conv1 (one MXU matmul on prebuilt bf16 strided patches,
    bn2 scale folded) -> +shift, LeakyReLU -> conv2 (3x3 taps) -> + 1x1 strided shortcut."""
    Hp, Wp, Cout = h_pad.shape
    Ho, Wo = Hp - 2, Wp - 2

    h1 = jnp.dot(p_ref[0], w1_ref[...], preferred_element_type=jnp.float32) + b2_ref[...]
    h1 = _lrelu(h1)

    _zero_halo(h_pad)
    h_pad[1:Ho + 1, 1:Wo + 1, :] = h1.reshape(Ho, Wo, Cout)

    # 1x1 stride-s shortcut seeds the conv2 accumulator; conv2 = 9 shifted in-VMEM taps.
    acc = jnp.dot(src_ref[0], ws_ref[...], preferred_element_type=jnp.float32)
    acc = _accum_3x3_taps(h_pad, w2_ref, Ho, Wo, acc)

    o_ref[...] = acc.reshape(1, Ho, Wo, Cout).astype(o_ref.dtype)


# ============================================================================= wrappers
def _fold_bn(bn):
    scale = bn["gamma"] / jnp.sqrt(bn["var"] + BN_EPS)
    shift = bn["beta"] - bn["mean"] * scale
    return scale, shift


def _bn_lrelu(x, scale, shift):
    return _lrelu(x * scale + shift)     # plain JAX; XLA fuses this into its consumers


def _im2col3x3(x, stride):
    """x: NHWC -> patches (N, Ho*Wo, 9*C); column order matches w.reshape(9*Cin, Cout)."""
    n, h, w, c = x.shape
    ho = (h + 2 - 3) // stride + 1
    wo = (w + 2 - 3) // stride + 1
    xp = jnp.pad(x, ((0, 0), (1, 1), (1, 1), (0, 0)))
    cols = []
    for kh in range(3):
        for kw in range(3):
            cols.append(xp[:, kh:kh + (ho - 1) * stride + 1:stride,
                           kw:kw + (wo - 1) * stride + 1:stride, :])
    patches = jnp.concatenate(cols, axis=-1)                     # (N, Ho, Wo, 9*C)
    return patches.reshape(n, ho * wo, 9 * c), (ho, wo)


def _fused_block_stride1(x, p, equal, abr):
    n, h, w, cin = x.shape
    cout = p["conv1"].shape[-1]
    s1, b1 = _fold_bn(p["bn1"])
    s2, b2 = _fold_bn(p["bn2"])
    # Fold bn2's scale into conv1's output columns in f32, then quantize weights to bf16 (MXU).
    w1f = (p["conv1"] * s2[None, None, None, :]).astype(jnp.bfloat16)
    w2 = p["conv2"].astype(jnp.bfloat16)

    kernel = _make_stride1_block_kernel(equal=equal, apply_bn1=(equal or abr))

    args = [x, w1f, w2]
    in_specs = [
        pl.BlockSpec((1, h, w, cin), lambda i: (i, 0, 0, 0)),
        _const_spec((3, 3, cin, cout)),
        _const_spec((3, 3, cout, cout)),
    ]
    if not equal:
        args.append(p["w_short"].astype(jnp.bfloat16))
        in_specs.append(_const_spec((cin, cout)))
    args += [s1.reshape(1, cin), b1.reshape(1, cin), b2.reshape(1, cout)]
    in_specs += [_const_spec((1, cin)), _const_spec((1, cin)), _const_spec((1, cout))]

    return pl.pallas_call(
        kernel,
        out_shape=jax.ShapeDtypeStruct((n, h, w, cout), jnp.float32),
        grid=(n,),
        in_specs=in_specs,
        out_specs=pl.BlockSpec((1, h, w, cout), lambda i: (i, 0, 0, 0)),
        scratch_shapes=[
            pltpu.VMEM((h + 2, w + 2, cin), jnp.float32),
            pltpu.VMEM((h + 2, w + 2, cout), jnp.float32),
        ],
        compiler_params=pltpu.CompilerParams(
            dimension_semantics=("parallel",), vmem_limit_bytes=_vmem_limit_bytes()),
    )(*args)


def _transition_block(x, p):
    n, h, w, cin = x.shape
    cout = p["conv1"].shape[-1]
    stride = p["stride"]
    abr = p["activate_before_residual"]
    s2, b2 = _fold_bn(p["bn2"])

    if abr:
        s1, b1 = _fold_bn(p["bn1"])
        src = _bn_lrelu(x, s1, b1)       # relu1(bn1(x)); feeds both conv1 and the 1x1 shortcut
    else:
        src = x                          # PyTorch quirk: bn1/relu1 output is dead on this branch

    # conv1 patches + strided shortcut input enter the kernel as bf16 matmul operands
    # (halves their HBM traffic); bn2's scale is folded into conv1's bf16 weight columns.
    patches, (ho, wo) = _im2col3x3(src, stride)
    patches = patches.astype(jnp.bfloat16)                                 # (N, Ho*Wo, 9*Cin)
    short = src[:, ::stride, ::stride, :].reshape(n, ho * wo, cin).astype(jnp.bfloat16)
    w1f = (p["conv1"] * s2[None, None, None, :]).reshape(9 * cin, cout).astype(jnp.bfloat16)
    w2 = p["conv2"].astype(jnp.bfloat16)
    ws = p["w_short"].astype(jnp.bfloat16)

    return pl.pallas_call(
        _transition_block_kernel,
        out_shape=jax.ShapeDtypeStruct((n, ho, wo, cout), jnp.float32),
        grid=(n,),
        in_specs=[
            pl.BlockSpec((1, ho * wo, 9 * cin), lambda i: (i, 0, 0)),
            _const_spec((9 * cin, cout)),
            _const_spec((1, cout)),
            _const_spec((3, 3, cout, cout)),
            pl.BlockSpec((1, ho * wo, cin), lambda i: (i, 0, 0)),
            _const_spec((cin, cout)),
        ],
        out_specs=pl.BlockSpec((1, ho, wo, cout), lambda i: (i, 0, 0, 0)),
        scratch_shapes=[pltpu.VMEM((ho + 2, wo + 2, cout), jnp.float32)],
        compiler_params=pltpu.CompilerParams(
            dimension_semantics=("parallel",), vmem_limit_bytes=_vmem_limit_bytes()),
    )(patches, w1f, b2.reshape(1, cout), w2, short, ws)


def basic_block_forward(x, p):
    n, h, w, cin = x.shape
    cout = p["conv1"].shape[-1]
    stride = p["stride"]
    equal = (cin == cout)
    abr = p["activate_before_residual"]
    if equal:
        # PyTorch BasicBlock with equal in/out planes has no convShortcut -> stride must be 1.
        assert stride == 1, "equal-in/out BasicBlock requires stride == 1"
    if stride == 1:
        return _fused_block_stride1(x, p, equal=equal, abr=abr)
    return _transition_block(x, p)


def network_block_forward(x_nchw, layer_params):
    x = jnp.transpose(x_nchw, (0, 2, 3, 1)).astype(jnp.float32)   # NCHW -> NHWC
    for p in layer_params:
        x = basic_block_forward(x, p)
    return jnp.transpose(x, (0, 3, 1, 2))                          # NHWC -> NCHW


# ============================================================================= params
def _init_bn(keys, c):
    return dict(
        gamma=jax.random.uniform(keys[0], (c,), jnp.float32, 0.5, 1.5),
        beta=0.1 * jax.random.normal(keys[1], (c,), jnp.float32),
        mean=0.1 * jax.random.normal(keys[2], (c,), jnp.float32),
        var=jax.random.uniform(keys[3], (c,), jnp.float32, 0.5, 1.5),
    )


def init_basic_block(key, cin, cout, stride, activate_before_residual):
    ks = jax.random.split(key, 11)
    p = dict(
        stride=stride,
        activate_before_residual=activate_before_residual,
        bn1=_init_bn(ks[0:4], cin),
        conv1=jax.random.normal(ks[4], (3, 3, cin, cout), jnp.float32) * jnp.sqrt(2.0 / (9 * cin)),
        bn2=_init_bn(ks[5:9], cout),
        conv2=jax.random.normal(ks[9], (3, 3, cout, cout), jnp.float32) * jnp.sqrt(2.0 / (9 * cout)),
    )
    if cin != cout:
        p["w_short"] = jax.random.normal(ks[10], (cin, cout), jnp.float32) * jnp.sqrt(2.0 / cin)
    return p


def init_network_block(key, nb_layers, in_planes, out_planes, stride, activate_before_residual):
    keys = jax.random.split(key, nb_layers)
    layers = []
    for i in range(nb_layers):
        layers.append(init_basic_block(
            keys[i],
            in_planes if i == 0 else out_planes,
            out_planes,
            stride if i == 0 else 1,
            activate_before_residual,
        ))
    return layers


# ============================================================================= pure-JAX reference
# Same structure as the PyTorch BasicBlock forward (inference BN), with conv operands quantized to
# bf16 and accumulated in f32 — i.e. exactly the MXU numerics the kernel uses — so the check below
# validates the fused block structure (BN folding, dead-bn1 quirk, residual/shortcut paths, stride)
# at a tight tolerance.
def _conv_ref(x_bf16, w_bf16, stride, pad):
    return jax.lax.conv_general_dilated(
        x_bf16, w_bf16, window_strides=(stride, stride), padding=((pad, pad), (pad, pad)),
        dimension_numbers=("NHWC", "HWIO", "NHWC"),
        preferred_element_type=jnp.float32)


def basic_block_ref(x, p):
    cin = x.shape[-1]
    cout = p["conv1"].shape[-1]
    equal = (cin == cout)
    s1, b1 = _fold_bn(p["bn1"])
    s2, b2 = _fold_bn(p["bn2"])
    w1f = (p["conv1"] * s2[None, None, None, :]).astype(jnp.bfloat16)   # bn2 scale folded, as in kernel
    w2 = p["conv2"].astype(jnp.bfloat16)

    if (not equal) and p["activate_before_residual"]:
        x = _bn_lrelu(x, s1, b1)                    # x is replaced, as in PyTorch
        conv1_in = x
    else:
        out = _bn_lrelu(x, s1, b1)
        conv1_in = out if equal else x              # bn1 output dead when cin!=cout and not abr

    h = _conv_ref(conv1_in.astype(jnp.bfloat16), w1f, p["stride"], 1) + b2
    h = _lrelu(h)
    out = _conv_ref(h.astype(jnp.bfloat16), w2, 1, 1)

    if equal:
        shortcut = x
    else:
        ws = p["w_short"].astype(jnp.bfloat16).reshape(1, 1, cin, cout)
        shortcut = _conv_ref(x.astype(jnp.bfloat16), ws, p["stride"], 0)
    return shortcut + out


def network_block_ref(x_nchw, layer_params):
    x = jnp.transpose(x_nchw, (0, 2, 3, 1)).astype(jnp.float32)
    for p in layer_params:
        x = basic_block_ref(x, p)
    return jnp.transpose(x, (0, 3, 1, 2))


# ============================================================================= main
if __name__ == "__main__":
    key = jax.random.PRNGKey(0)
    kx, kp = jax.random.split(key)

    # NetworkBlock(nb_layers=2, in_planes=4, out_planes=8, block=BasicBlock, stride=2,
    #              drop_rate=0.0, activate_before_residual=True)
    x_nchw = jax.random.normal(kx, (2, 4, 16, 16), jnp.float32)
    params = init_network_block(kp, nb_layers=2, in_planes=4, out_planes=8,
                                stride=2, activate_before_residual=True)

    out = jax.block_until_ready(network_block_forward(x_nchw, params))
    assert out.shape == (2, 8, 8, 8), out.shape

    ref = jax.block_until_ready(network_block_ref(x_nchw, params))
    assert jnp.allclose(out, ref, rtol=2e-3, atol=2e-3), float(jnp.max(jnp.abs(out - ref)))

    print("KERNEL_OK")
</pallas_src>

<mosaic_0001>
module attributes {stable_mosaic.version = 11 : i64} {
  func.func @_probe(%arg0: i32, %arg1: memref<8x128xf32, #tpu.memory_space<vmem>>, %arg2: memref<8x128xf32, #tpu.memory_space<vmem>>) attributes {dimension_semantics = [#tpu.dimension_semantics<arbitrary>], iteration_bounds = array<i64: 2>, scalar_prefetch = 0 : i64, scratch_operands = 0 : i64, tpu.core_type = #tpu.core_type<tc>, window_params = [{pipeline_mode = #tpu.pipeline_mode<synchronous>, transform_indices = @transform_0, window_bounds = array<i64: 8, 128>}, {pipeline_mode = #tpu.pipeline_mode<synchronous>, transform_indices = @transform_1, window_bounds = array<i64: 8, 128>}]} {
    %c0 = arith.constant 0 : index
    %c0_0 = arith.constant 0 : index
    %0 = vector.load %arg1[%c0, %c0_0] : memref<8x128xf32, #tpu.memory_space<vmem>>, vector<8x128xf32>
    %cst = arith.constant 2.000000e+00 : f32
    %1 = vector.broadcast %cst : f32 to vector<8x128xf32>
    %2 = arith.mulf %0, %1 : vector<8x128xf32>
    %c0_1 = arith.constant 0 : index
    %c0_2 = arith.constant 0 : index
    %3 = vector.load %arg2[%c0_1, %c0_2] : memref<8x128xf32, #tpu.memory_space<vmem>>, vector<8x128xf32>
    tpu.vector_store %arg2[%c0_1, %c0_2], %2 {strides = array<i32>} : memref<8x128xf32, #tpu.memory_space<vmem>>, vector<8x128xf32>,
    return
  }
  func.func @transform_0(%arg0: i32) -> (i32, i32) {
    %c0_i32 = arith.constant 0 : i32
    %c0_i32_0 = arith.constant 0 : i32
    %c0_i32_1 = arith.constant 0 : i32
    return %c0_i32, %c0_i32_0 : i32, i32
  }
  func.func @transform_1(%arg0: i32) -> (i32, i32) {
    %c0_i32 = arith.constant 0 : i32
    %c0_i32_0 = arith.constant 0 : i32
    %c0_i32_1 = arith.constant 0 : i32
    return %c0_i32, %c0_i32_0 : i32, i32
  }
}

module attributes {stable_mosaic.version = 11 : i64} {
  func.func @_transition_block_kernel(%arg0: i32, %arg1: memref<1x64x36xbf16, #tpu.memory_space<vmem>>, %arg2: memref<36x8xbf16, #tpu.memory_space<vmem>>, %arg3: memref<1x8xf32, #tpu.memory_space<vmem>>, %arg4: memref<3x3x8x8xbf16, #tpu.memory_space<vmem>>, %arg5: memref<1x64x4xbf16, #tpu.memory_space<vmem>>, %arg6: memref<4x8xbf16, #tpu.memory_space<vmem>>, %arg7: memref<1x8x8x8xf32, #tpu.memory_space<vmem>>, %arg8: memref<10x10x8xf32, #tpu.memory_space<vmem>>) attributes {dimension_semantics = [#tpu.dimension_semantics<parallel>], iteration_bounds = array<i64: 2>, scalar_prefetch = 0 : i64, scratch_operands = 1 : i64, tpu.core_type = #tpu.core_type<tc>, window_params = [{transform_indices = @transform_0, window_bounds = array<i64: 1, 64, 36>}, {pipeline_mode = #tpu.pipeline_mode<synchronous>, transform_indices = @transform_1, window_bounds = array<i64: 36, 8>}, {pipeline_mode = #tpu.pipeline_mode<synchronous>, transform_indices = @transform_2, window_bounds = array<i64: 1, 8>}, {pipeline_mode = #tpu.pipeline_mode<synchronous>, transform_indices = @transform_3, window_bounds = array<i64: 3, 3, 8, 8>}, {transform_indices = @transform_4, window_bounds = array<i64: 1, 64, 4>}, {pipeline_mode = #tpu.pipeline_mode<synchronous>, transform_indices = @transform_5, window_bounds = array<i64: 4, 8>}, {transform_indices = @transform_6, window_bounds = array<i64: 1, 8, 8, 8>}]} {
    %c0 = arith.constant 0 : index
    %c0_0 = arith.constant 0 : index
    %c0_1 = arith.constant 0 : index
    %0 = vector.load %arg1[%c0, %c0_0, %c0_1] : memref<1x64x36xbf16, #tpu.memory_space<vmem>>, vector<1x64x36xbf16>
    %1 = vector.shape_cast %0 : vector<1x64x36xbf16> to vector<64x36xbf16>
    %c0_2 = arith.constant 0 : index
    %c0_3 = arith.constant 0 : index
    %2 = vector.load %arg2[%c0_2, %c0_3] : memref<36x8xbf16, #tpu.memory_space<vmem>>, vector<36x8xbf16>
    %cst = arith.constant dense<0.000000e+00> : vector<64x8xf32>
    %3 = tpu.matmul %1, %2, %cst {dimension_numbers = #tpu.dot_dimension_numbers<[1], [0], [0], [1], [0, 0, 1, 1], [], []>} : vector<64x36xbf16>, vector<36x8xbf16>, vector<64x8xf32> -> vector<64x8xf32>
    %c0_4 = arith.constant 0 : index
    %c0_5 = arith.constant 0 : index
    %4 = vector.load %arg3[%c0_4, %c0_5] : memref<1x8xf32, #tpu.memory_space<vmem>>, vector<1x8xf32>
    %5 = vector.broadcast %4 : vector<1x8xf32> to vector<64x8xf32>
    %6 = arith.addf %3, %5 : vector<64x8xf32>
    %cst_6 = arith.constant 0.000000e+00 : f32
    %7 = vector.broadcast %cst_6 : f32 to vector<64x8xf32>
    %8 = arith.cmpf oge, %6, %7 : vector<64x8xf32>
    %cst_7 = arith.constant 1.000000e-01 : f32
    %9 = vector.broadcast %cst_7 : f32 to vector<64x8xf32>
    %10 = arith.mulf %9, %6 : vector<64x8xf32>
    %11 = arith.select %8, %6, %10 : vector<64x8xi1>, vector<64x8xf32>
    %cst_8 = arith.constant 0.000000e+00 : f32
    %12 = vector.broadcast %cst_8 : f32 to vector<1x10x8xf32>
    %cst_9 = arith.constant 0.000000e+00 : f32
    %13 = vector.broadcast %cst_9 : f32 to vector<10x1x8xf32>
    %c0_10 = arith.constant 0 : index
    %c0_11 = arith.constant 0 : index
    %c0_12 = arith.constant 0 : index
    %14 = vector.load %arg8[%c0_10, %c0_11, %c0_12] : memref<10x10x8xf32, #tpu.memory_space<vmem>>, vector<1x10x8xf32>
    tpu.vector_store %arg8[%c0_10, %c0_11, %c0_12], %12 {strides = array<i32>} : memref<10x10x8xf32, #tpu.memory_space<vmem>>, vector<1x10x8xf32>,
    %c9 = arith.constant 9 : index
    %c0_13 = arith.constant 0 : index
    %c0_14 = arith.constant 0 : index
    %15 = vector.load %arg8[%c9, %c0_13, %c0_14] : memref<10x10x8xf32, #tpu.memory_space<vmem>>, vector<1x10x8xf32>
    tpu.vector_store %arg8[%c9, %c0_13, %c0_14], %12 {strides = array<i32>} : memref<10x10x8xf32, #tpu.memory_space<vmem>>, vector<1x10x8xf32>,
    %c0_15 = arith.constant 0 : index
    %c0_16 = arith.constant 0 : index
    %c0_17 = arith.constant 0 : index
    %16 = vector.load %arg8[%c0_15, %c0_16, %c0_17] : memref<10x10x8xf32, #tpu.memory_space<vmem>>, vector<10x1x8xf32>
    tpu.vector_store %arg8[%c0_15, %c0_16, %c0_17], %13 {strides = array<i32>} : memref<10x10x8xf32, #tpu.memory_space<vmem>>, vector<10x1x8xf32>,
    %c0_18 = arith.constant 0 : index
    %c9_19 = arith.constant 9 : index
    %c0_20 = arith.constant 0 : index
    %17 = vector.load %arg8[%c0_18, %c9_19, %c0_20] : memref<10x10x8xf32, #tpu.memory_space<vmem>>, vector<10x1x8xf32>
    tpu.vector_store %arg8[%c0_18, %c9_19, %c0_20], %13 {strides = array<i32>} : memref<10x10x8xf32, #tpu.memory_space<vmem>>, vector<10x1x8xf32>,
    %18 = vector.shape_cast %11 : vector<64x8xf32> to vector<8x8x8xf32>
    %c1 = arith.constant 1 : index
    %c1_21 = arith.constant 1 : index
    %c0_22 = arith.constant 0 : index
    %19 = vector.load %arg8[%c1, %c1_21, %c0_22] : memref<10x10x8xf32, #tpu.memory_space<vmem>>, vector<8x8x8xf32>
    tpu.vector_store %arg8[%c1, %c1_21, %c0_22], %18 {strides = array<i32>} : memref<10x10x8xf32, #tpu.memory_space<vmem>>, vector<8x8x8xf32>,
    %c0_23 = arith.constant 0 : index
    %c0_24 = arith.constant 0 : index
    %c0_25 = arith.constant 0 : index
    %20 = vector.load %arg5[%c0_23, %c0_24, %c0_25] : memref<1x64x4xbf16, #tpu.memory_space<vmem>>, vector<1x64x4xbf16>
    %21 = vector.shape_cast %20 : vector<1x64x4xbf16> to vector<64x4xbf16>
    %c0_26 = arith.constant 0 : index
    %c0_27 = arith.constant 0 : index
    %22 = vector.load %arg6[%c0_26, %c0_27] : memref<4x8xbf16, #tpu.memory_space<vmem>>, vector<4x8xbf16>
    %cst_28 = arith.constant dense<0.000000e+00> : vector<64x8xf32>
    %23 = tpu.matmul %21, %22, %cst_28 {dimension_numbers = #tpu.dot_dimension_numbers<[1], [0], [0], [1], [0, 0, 1, 1], [], []>} : vector<64x4xbf16>, vector<4x8xbf16>, vector<64x8xf32> -> vector<64x8xf32>
    %c0_29 = arith.constant 0 : index
    %c0_30 = arith.constant 0 : index
    %c0_31 = arith.constant 0 : index
    %24 = vector.load %arg8[%c0_29, %c0_30, %c0_31] : memref<10x10x8xf32, #tpu.memory_space<vmem>>, vector<10x8x8xf32>
    %25 = vector.shape_cast %24 : vector<10x8x8xf32> to vector<80x8xf32>
    %26 = vector.extract_strided_slice %25 {offsets = [0, 0], sizes = [64, 8], strides = [1, 1]} : vector<80x8xf32> to vector<64x8xf32>
    %27 = arith.truncf %26 : vector<64x8xf32> to vector<64x8xbf16>
    %c0_32 = arith.constant 0 : index
    %c0_33 = arith.constant 0 : index
    %c0_34 = arith.constant 0 : index
    %c0_35 = arith.constant 0 : index
    %28 = vector.load %arg4[%c0_32, %c0_33, %c0_34, %c0_35] : memref<3x3x8x8xbf16, #tpu.memory_space<vmem>>, vector<1x1x8x8xbf16>
    %29 = vector.shape_cast %28 : vector<1x1x8x8xbf16> to vector<8x8xbf16>
    %cst_36 = arith.constant dense<0.000000e+00> : vector<64x8xf32>
    %30 = tpu.matmul %27, %29, %cst_36 {dimension_numbers = #tpu.dot_dimension_numbers<[1], [0], [0], [1], [0, 0, 1, 1], [], []>} : vector<64x8xbf16>, vector<8x8xbf16>, vector<64x8xf32> -> vector<64x8xf32>
    %31 = arith.addf %23, %30 : vector<64x8xf32>
    %32 = vector.extract_strided_slice %25 {offsets = [8, 0], sizes = [64, 8], strides = [1, 1]} : vector<80x8xf32> to vector<64x8xf32>
    %33 = arith.truncf %32 : vector<64x8xf32> to vector<64x8xbf16>
    %c1_37 = arith.constant 1 : index
    %c0_38 = arith.constant 0 : index
    %c0_39 = arith.constant 0 : index
    %c0_40 = arith.constant 0 : index
    %34 = vector.load %arg4[%c1_37, %c0_38, %c0_39, %c0_40] : memref<3x3x8x8xbf16, #tpu.memory_space<vmem>>, vector<1x1x8x8xbf16>
    %35 = vector.shape_cast %34 : vector<1x1x8x8xbf16> to vector<8x8xbf16>
    %cst_41 = arith.constant dense<0.000000e+00> : vector<64x8xf32>
    %36 = tpu.matmul %33, %35, %cst_41 {dimension_numbers = #tpu.dot_dimension_numbers<[1], [0], [0], [1], [0, 0, 1, 1], [], []>} : vector<64x8xbf16>, vector<8x8xbf16>, vector<64x8xf32> -> vector<64x8xf32>
    %37 = arith.addf %31, %36 : vector<64x8xf32>
    %38 = vector.extract_strided_slice %25 {offsets = [16, 0], sizes = [64, 8], strides = [1, 1]} : vector<80x8xf32> to vector<64x8xf32>
    %39 = arith.truncf %38 : vector<64x8xf32> to vector<64x8xbf16>
    %c2 = arith.constant 2 : index
    %c0_42 = arith.constant 0 : index
    %c0_43 = arith.constant 0 : index
    %c0_44 = arith.constant 0 : index
    %40 = vector.load %arg4[%c2, %c0_42, %c0_43, %c0_44] : memref<3x3x8x8xbf16, #tpu.memory_space<vmem>>, vector<1x1x8x8xbf16>
    %41 = vector.shape_cast %40 : vector<1x1x8x8xbf16> to vector<8x8xbf16>
    %cst_45 = arith.constant dense<0.000000e+00> : vector<64x8xf32>
    %42 = tpu.matmul %39, %41, %cst_45 {dimension_numbers = #tpu.dot_dimension_numbers<[1], [0], [0], [1], [0, 0, 1, 1], [], []>} : vector<64x8xbf16>, vector<8x8xbf16>, vector<64x8xf32> -> vector<64x8xf32>
    %43 = arith.addf %37, %42 : vector<64x8xf32>
    %c0_46 = arith.constant 0 : index
    %c1_47 = arith.constant 1 : index
    %c0_48 = arith.constant 0 : index
    %44 = vector.load %arg8[%c0_46, %c1_47, %c0_48] : memref<10x10x8xf32, #tpu.memory_space<vmem>>, vector<10x8x8xf32>
    %45 = vector.shape_cast %44 : vector<10x8x8xf32> to vector<80x8xf32>
    %46 = vector.extract_strided_slice %45 {offsets = [0, 0], sizes = [64, 8], strides = [1, 1]} : vector<80x8xf32> to vector<64x8xf32>
    %47 = arith.truncf %46 : vector<64x8xf32> to vector<64x8xbf16>
    %c0_49 = arith.constant 0 : index
    %c1_50 = arith.constant 1 : index
    %c0_51 = arith.constant 0 : index
    %c0_52 = arith.constant 0 : index
    %48 = vector.load %arg4[%c0_49, %c1_50, %c0_51, %c0_52] : memref<3x3x8x8xbf16, #tpu.memory_space<vmem>>, vector<1x1x8x8xbf16>
    %49 = vector.shape_cast %48 : vector<1x1x8x8xbf16> to vector<8x8xbf16>
    %cst_53 = arith.constant dense<0.000000e+00> : vector<64x8xf32>
    %50 = tpu.matmul %47, %49, %cst_53 {dimension_numbers = #tpu.dot_dimension_numbers<[1], [0], [0], [1], [0, 0, 1, 1], [], []>} : vector<64x8xbf16>, vector<8x8xbf16>, vector<64x8xf32> -> vector<64x8xf32>
    %51 = arith.addf %43, %50 : vector<64x8xf32>
    %52 = vector.extract_strided_slice %45 {offsets = [8, 0], sizes = [64, 8], strides = [1, 1]} : vector<80x8xf32> to vector<64x8xf32>
    %53 = arith.truncf %52 : vector<64x8xf32> to vector<64x8xbf16>
    %c1_54 = arith.constant 1 : index
    %c1_55 = arith.constant 1 : index
    %c0_56 = arith.constant 0 : index
    %c0_57 = arith.constant 0 : index
    %54 = vector.load %arg4[%c1_54, %c1_55, %c0_56, %c0_57] : memref<3x3x8x8xbf16, #tpu.memory_space<vmem>>, vector<1x1x8x8xbf16>
    %55 = vector.shape_cast %54 : vector<1x1x8x8xbf16> to vector<8x8xbf16>
    %cst_58 = arith.constant dense<0.000000e+00> : vector<64x8xf32>
    %56 = tpu.matmul %53, %55, %cst_58 {dimension_numbers = #tpu.dot_dimension_numbers<[1], [0], [0], [1], [0, 0, 1, 1], [], []>} : vector<64x8xbf16>, vector<8x8xbf16>, vector<64x8xf32> -> vector<64x8xf32>
    %57 = arith.addf %51, %56 : vector<64x8xf32>
    %58 = vector.extract_strided_slice %45 {offsets = [16, 0], sizes = [64, 8], strides = [1, 1]} : vector<80x8xf32> to vector<64x8xf32>
    %59 = arith.truncf %58 : vector<64x8xf32> to vector<64x8xbf16>
    %c2_59 = arith.constant 2 : index
    %c1_60 = arith.constant 1 : index
    %c0_61 = arith.constant 0 : index
    %c0_62 = arith.constant 0 : index
    %60 = vector.load %arg4[%c2_59, %c1_60, %c0_61, %c0_62] : memref<3x3x8x8xbf16, #tpu.memory_space<vmem>>, vector<1x1x8x8xbf16>
    %61 = vector.shape_cast %60 : vector<1x1x8x8xbf16> to vector<8x8xbf16>
    %cst_63 = arith.constant dense<0.000000e+00> : vector<64x8xf32>
    %62 = tpu.matmul %59, %61, %cst_63 {dimension_numbers = #tpu.dot_dimension_numbers<[1], [0], [0], [1], [0, 0, 1, 1], [], []>} : vector<64x8xbf16>, vector<8x8xbf16>, vector<64x8xf32> -> vector<64x8xf32>
    %63 = arith.addf %57, %62 : vector<64x8xf32>
    %c0_64 = arith.constant 0 : index
    %c2_65 = arith.constant 2 : index
    %c0_66 = arith.constant 0 : index
    %64 = vector.load %arg8[%c0_64, %c2_65, %c0_66] : memref<10x10x8xf32, #tpu.memory_space<vmem>>, vector<10x8x8xf32>
    %65 = vector.shape_cast %64 : vector<10x8x8xf32> to vector<80x8xf32>
    %66 = vector.extract_strided_slice %65 {offsets = [0, 0], sizes = [64, 8], strides = [1, 1]} : vector<80x8xf32> to vector<64x8xf32>
    %67 = arith.truncf %66 : vector<64x8xf32> to vector<64x8xbf16>
    %c0_67 = arith.constant 0 : index
    %c2_68 = arith.constant 2 : index
    %c0_69 = arith.constant 0 : index
    %c0_70 = arith.constant 0 : index
    %68 = vector.load %arg4[%c0_67, %c2_68, %c0_69, %c0_70] : memref<3x3x8x8xbf16, #tpu.memory_space<vmem>>, vector<1x1x8x8xbf16>
    %69 = vector.shape_cast %68 : vector<1x1x8x8xbf16> to vector<8x8xbf16>
    %cst_71 = arith.constant dense<0.000000e+00> : vector<64x8xf32>
    %70 = tpu.matmul %67, %69, %cst_71 {dimension_numbers = #tpu.dot_dimension_numbers<[1], [0], [0], [1], [0, 0, 1, 1], [], []>} : vector<64x8xbf16>, vector<8x8xbf16>, vector<64x8xf32> -> vector<64x8xf32>
    %71 = arith.addf %63, %70 : vector<64x8xf32>
    %72 = vector.extract_strided_slice %65 {offsets = [8, 0], sizes = [64, 8], strides = [1, 1]} : vector<80x8xf32> to vector<64x8xf32>
    %73 = arith.truncf %72 : vector<64x8xf32> to vector<64x8xbf16>
    %c1_72 = arith.constant 1 : index
    %c2_73 = arith.constant 2 : index
    %c0_74 = arith.constant 0 : index
    %c0_75 = arith.constant 0 : index
    %74 = vector.load %arg4[%c1_72, %c2_73, %c0_74, %c0_75] : memref<3x3x8x8xbf16, #tpu.memory_space<vmem>>, vector<1x1x8x8xbf16>
    %75 = vector.shape_cast %74 : vector<1x1x8x8xbf16> to vector<8x8xbf16>
    %cst_76 = arith.constant dense<0.000000e+00> : vector<64x8xf32>
    %76 = tpu.matmul %73, %75, %cst_76 {dimension_numbers = #tpu.dot_dimension_numbers<[1], [0], [0], [1], [0, 0, 1, 1], [], []>} : vector<64x8xbf16>, vector<8x8xbf16>, vector<64x8xf32> -> vector<64x8xf32>
    %77 = arith.addf %71, %76 : vector<64x8xf32>
    %78 = vector.extract_strided_slice %65 {offsets = [16, 0], sizes = [64, 8], strides = [1, 1]} : vector<80x8xf32> to vector<64x8xf32>
    %79 = arith.truncf %78 : vector<64x8xf32> to vector<64x8xbf16>
    %c2_77 = arith.constant 2 : index
    %c2_78 = arith.constant 2 : index
    %c0_79 = arith.constant 0 : index
    %c0_80 = arith.constant 0 : index
    %80 = vector.load %arg4[%c2_77, %c2_78, %c0_79, %c0_80] : memref<3x3x8x8xbf16, #tpu.memory_space<vmem>>, vector<1x1x8x8xbf16>
    %81 = vector.shape_cast %80 : vector<1x1x8x8xbf16> to vector<8x8xbf16>
    %cst_81 = arith.constant dense<0.000000e+00> : vector<64x8xf32>
    %82 = tpu.matmul %79, %81, %cst_81 {dimension_numbers = #tpu.dot_dimension_numbers<[1], [0], [0], [1], [0, 0, 1, 1], [], []>} : vector<64x8xbf16>, vector<8x8xbf16>, vector<64x8xf32> -> vector<64x8xf32>
    %83 = arith.addf %77, %82 : vector<64x8xf32>
    %84 = vector.shape_cast %83 : vector<64x8xf32> to vector<1x8x8x8xf32>
    %c0_82 = arith.constant 0 : index
    %c0_83 = arith.constant 0 : index
    %c0_84 = arith.constant 0 : index
    %c0_85 = arith.constant 0 : index
    %85 = vector.load %arg7[%c0_82, %c0_83, %c0_84, %c0_85] : memref<1x8x8x8xf32, #tpu.memory_space<vmem>>, vector<1x8x8x8xf32>
    tpu.vector_store %arg7[%c0_82, %c0_83, %c0_84, %c0_85], %84 {strides = array<i32>} : memref<1x8x8x8xf32, #tpu.memory_space<vmem>>, vector<1x8x8x8xf32>,
    return
  }
  func.func @transform_0(%arg0: i32) -> (i32, i32, i32) {
    %c0_i32 = arith.constant 0 : i32
    %c0_i32_0 = arith.constant 0 : i32
    %c0_i32_1 = arith.constant 0 : i32
    return %arg0, %c0_i32, %c0_i32_0 : i32, i32, i32
  }
  func.func @transform_1(%arg0: i32) -> (i32, i32) {
    %c0_i32 = arith.constant 0 : i32
    %c0_i32_0 = arith.constant 0 : i32
    %c0_i32_1 = arith.constant 0 : i32
    return %c0_i32, %c0_i32_0 : i32, i32
  }
  func.func @transform_2(%arg0: i32) -> (i32, i32) {
    %c0_i32 = arith.constant 0 : i32
    %c0_i32_0 = arith.constant 0 : i32
    %c0_i32_1 = arith.constant 0 : i32
    return %c0_i32, %c0_i32_0 : i32, i32
  }
  func.func @transform_3(%arg0: i32) -> (i32, i32, i32, i32) {
    %c0_i32 = arith.constant 0 : i32
    %c0_i32_0 = arith.constant 0 : i32
    %c0_i32_1 = arith.constant 0 : i32
    %c0_i32_2 = arith.constant 0 : i32
    %c0_i32_3 = arith.constant 0 : i32
    return %c0_i32, %c0_i32_0, %c0_i32_1, %c0_i32_2 : i32, i32, i32, i32
  }
  func.func @transform_4(%arg0: i32) -> (i32, i32, i32) {
    %c0_i32 = arith.constant 0 : i32
    %c0_i32_0 = arith.constant 0 : i32
    %c0_i32_1 = arith.constant 0 : i32
    return %arg0, %c0_i32, %c0_i32_0 : i32, i32, i32
  }
  func.func @transform_5(%arg0: i32) -> (i32, i32) {
    %c0_i32 = arith.constant 0 : i32
    %c0_i32_0 = arith.constant 0 : i32
    %c0_i32_1 = arith.constant 0 : i32
    return %c0_i32, %c0_i32_0 : i32, i32
  }
  func.func @transform_6(%arg0: i32) -> (i32, i32, i32, i32) {
    %c0_i32 = arith.constant 0 : i32
    %c0_i32_0 = arith.constant 0 : i32
    %c0_i32_1 = arith.constant 0 : i32
    %c0_i32_2 = arith.constant 0 : i32
    return %arg0, %c0_i32, %c0_i32_0, %c0_i32_1 : i32, i32, i32, i32
  }
}

</mosaic_0001>

<bundles_post_ra>
// kernel: tpu_custom_call.1
= control target key start
LH: loop header
LB: loop body
LE: loop exit
PB: predicated region body
PF: predicated region fallthrough
CT: control target
= control target key end

     0   :  { %6 = vsyncpa [#allocation3], 0  ;;  %s341_s0 = inlined_call_operand.hbm [shape: f32[8,128], index: 0, kind: input, shape index: {}]   ;;  %s342_s1 = inlined_call_operand.hbm [shape: f32[8,128], index: 1, kind: output, shape index: {}]  }
   0x1   :  { %7 = vsyncpa [#allocation4], 0  ;;  %s262_s6 = smov 0  }
   0x2 LB: > { %s145_s7 = sadd.s32 4294967295, %s248_s6   ;;  %p146_p0 = scmp.ge.s32.totalorder %s248_s6, 1  ;;  %s248_s6 = sphi %s262_s6, %s13_s6  }
   0x3   : > { %p60_p1 = scmp.lt.s32.totalorder %s248_s6, 3  ;;  %p276_p3 = scmp.eq.s32.totalorder %s145_s7, 0 }
   0x4   : > { %s250_s10 = smov [#allocation2]   ;;  %s180_s15 = scalar_lea.hbm %s341_s0, 128 }
   0x5   : > { %p270_p2 = pnand %p146_p0, %p60_p1  ;;  %s73_s11 = sshll.u32 %s250_s10, 4  ;;  %s74_s11 = int_to_ptr.vmem [resolvable:$true] %s73_s11 }
   0x6   : > { %s347_s9 = scalar_select %p276_p3, 1, 0 }
   0x7   : > { %s346_s8 = scalar_select %p270_p2, 1, 0 }
   0x8   : > { %p162_p4 = pneg %p270_p2  ;;  %p181_p6 = scmp.ne.s32.totalorder %s341_s0, %s180_s15 }
   0x9   : > { %p187_p10 = scmp.lt.u32.totalorder %s180_s15, %s341_s0 }
   0xa   : > { %p284_p5 = pnand %p276_p3, %p162_p4 }
   0xc   : > { %p182_p7 = pneg %p284_p5 }
   0xe   : > { %p183_p8 = pnand %p182_p7, %p181_p6 }
  0x10   : > { %p184_p9 = pneg %p183_p8 }
  0x12   : > { %p189_p11 = pnand %p187_p10, %p184_p9 }
  0x14   : > { %192 = shalt.err (!%p189_p11)
}
  0x15   : > { %s193_s20 = scalar_lea.vmem %s74_s11, 128  ;;  %p201_p1 = scmp.lt.s32.totalorder %s74_s11, %s74_s11 }
  0x16   : > { %p194_p12 = scmp.ne.s32.totalorder %s74_s11, %s193_s20  ;;  %p202_p4 = scmp.lt.s32.totalorder %s193_s20, %s193_s20 }
  0x18   : > { %p196_p13 = pnand %p194_p12, %p182_p7  ;;  %p203_p3 = por %p202_p4, %p201_p1 }
  0x1a   : > { %p197_p0 = pneg %p196_p13 }
  0x1c   : > { %p204_p2 = pnand %p203_p3, %p197_p0 }
  0x1e   : > { %207 = shalt.err (!%p204_p2)
}
  0x1f   : > { %165 = dma.hbm_to_vmem [thread:$0]  (!%p284_p5), %s341_s0, 128, %s74_s11, [#allocation3]  }
  0x20   : > { %p349_p6 = scmp.ne.s32.totalorder %s346_s8, 0 }
  0x21   : > { %p350_p8 = scmp.ne.s32.totalorder (!%p349_p6), %s347_s9, 0 }
  0x22   : > { %86 = sbr.rel (%p349_p6) target bundleno = 67 (0x43), region = 24 }
  0x29   : > { %239 = dma.done.wait (%p350_p8), [#allocation3], 128  }
  0x2a   : > { %241 = vsyncadd (%p350_p8), [#allocation3], 4294967168  ;;  %s251_s23 = smov [#allocation5]   ;;  %v96_v0 = vld [vmem:[#allocation2] sm:$0xff]  ;;  %p312_p2 = scmp.eq.s32.totalorder %s145_s7, 1 }
  0x2b   : > { %s106_s24 = sshll.u32 %s251_s23, 4  ;;  %v97_v1 = vmul.f32 2.0, %v96_v0  ;;  %s107_s24 = int_to_ptr.vmem [resolvable:$true] %s106_s24 }
  0x2c   : > { %s208_s26 = scalar_lea.vmem %s107_s24, 128  ;;  %p215_p9 = scmp.lt.s32.totalorder %s107_s24, %s107_s24 }
  0x2d   : > { %98 = vst [vmem:[#allocation5] sm:$0xff] %v97_v1  ;;  %p209_p3 = scmp.ne.s32.totalorder %s107_s24, %s208_s26  ;;  %p216_p10 = scmp.lt.s32.totalorder %s208_s26, %s208_s26 }
  0x2f   : > { %p210_p5 = pnand %p209_p3, %p312_p2  ;;  %p217_p11 = por %p216_p10, %p215_p9 }
  0x31   : > { %p211_p7 = pneg %p210_p5 }
  0x33   : > { %p218_p12 = pnand %p217_p11, %p211_p7 }
  0x35   : > { %221 = shalt.err (!%p218_p12)
}
  0x36   : > { %s222_s29 = scalar_lea.hbm %s342_s1, 128 }
  0x37   : > { %p223_p13 = scmp.ne.s32.totalorder %s342_s1, %s222_s29  ;;  %p228_p4 = scmp.lt.u32.totalorder %s222_s29, %s342_s1 }
  0x39   : > { %p224_p0 = pnand %p223_p13, %p312_p2 }
  0x3b   : > { %p225_p1 = pneg %p224_p0 }
  0x3d   : > { %p230_p6 = pnand %p228_p4, %p225_p1 }
  0x3f   : > { %233 = shalt.err (!%p230_p6)
}
  0x40   : > { %159 = dma.vmem_to_hbm [thread:$0]  (%p312_p2), %s107_s24, 128, %s342_s1, [#allocation4]  }
  0x41   : > { %243 = dma.done.wait (%p312_p2), [#allocation4], 128  }
  0x42   : > { %245 = vsyncadd (%p312_p2), [#allocation4], 4294967168 }
  0x43 PF: > { %s13_s6 = sadd.s32 1, %s248_s6  }
  0x44   : > { %p10_p8 = scmp.ge.s32.totalorder %s13_s6, 4  }
  0x46   :  { %12 = sbr.rel (!%p10_p8) target bundleno = 2 (0x2), region = 53 }
  0x4d   :  { %119 = vsyncpa [#allocation3], 1 }
  0x4e   :  { %121 = vsyncpa [#allocation3 + $0x1], 1 }
  0x4f   :  { %122 = vsyncpa [#allocation4], 1 }
  0x50   :  { %124 = vsyncpa [#allocation4 + $0x1], 1 }

// kernel: tpu_custom_call.1
= control target key start
LH: loop header
LB: loop body
LE: loop exit
PB: predicated region body
PF: predicated region fallthrough
CT: control target
= control target key end

     0   :  { %11 = vsyncpa [#allocation4], 0  ;;  %s2286_s0 = inlined_call_operand.vmem [shape: bf16[2,64,36], index: 0, kind: input, shape index: {}]   ;;  %s2287_s1 = inlined_call_operand.vmem [shape: bf16[36,8], index: 1, kind: input, shape index: {}]   ;;  %s2288_s2 = inlined_call_operand.vmem [shape: f32[1,8], index: 2, kind: input, shape index: {}]   ;;  %s2289_s3 = inlined_call_operand.vmem [shape: bf16[3,3,8,8], index: 3, kind: input, shape index: {}]   ;;  %s2290_s4 = inlined_call_operand.vmem [shape: bf16[2,64,4], index: 4, kind: input, shape index: {}]   ;;  %s2291_s5 = inlined_call_operand.vmem [shape: bf16[4,8], index: 5, kind: input, shape index: {}]   ;;  %s2292_s6 = inlined_call_operand.hbm [shape: f32[2,8,8,8], index: 6, kind: output, shape index: {}]  }
   0x1   :  { %13 = vsyncpa [#allocation4 + $0x1], 0  ;;  %s1998_s21 = smov 0   ;;  %s2000_s22 = smov 0  }
   0x2   :  { %s2002_s23 = smov 0   ;;  %s2004_s24 = smov 0  }
   0x3 LB: > { %s2019_s25 = sadd.s32 4294967295, %s1957_s24   ;;  %s1507_s26 = sadd.s32 4294967294, %s1957_s24   ;;  %s1957_s24 = sphi %s2004_s24, %s2298_s24   ;;  %s1953_s23 = sphi %s2002_s23, %s2297_s23   ;;  %s1949_s22 = sphi %s2000_s22, %s2296_s22   ;;  %s1945_s21 = sphi %s1998_s21, %s2295_s21  }
   0x4   : > { %s2023_s27 = sadd.s32 1, %s1957_s24   ;;  %s162_s28 = sadd.s32 1, %s1953_s23 }
   0x5   : > { %s159_s29 = ssub.s32 %s1957_s24, %s2023_s27  ;;  %p172_p0 = scmp.ne.s32.totalorder %s1953_s23, %s1949_s22 }
   0x6   : > { %p160_p1 = scmp.eq.s32.totalorder %s159_s29, 0  ;;  %p173_p2 = scmp.eq.s32.totalorder %s2019_s25, 1 }
   0x7   : > { %p178_p3 = scmp.ne.s32.totalorder %s1949_s22, %s1945_s21  ;;  %p179_p4 = scmp.eq.s32.totalorder %s1507_s26, 1 }
   0x8   : > { %s2034_s30 = scalar_select %p160_p1, %s1953_s23, %s162_s28  }
   0x9   : > { %p2036_p5 = por %p173_p2, %p172_p0  ;;  %p2040_p6 = por %p179_p4, %p178_p3 }
   0xa   : > { %p1510_p7 = scmp.ge.s32.totalorder %s1957_s24, 1  ;;  %p225_p8 = scmp.lt.s32.totalorder %s1957_s24, 3 }
   0xc   : > { %p226_p9 = pnand %p1510_p7, %p225_p8 }
   0xd   : > { %v1884_v0 = vld [vmem:[%s2287_s1] sm:$0xff] (!%p226_p9)   ;;  %v1885_v1 = vld [vmem:[%s2287_s1 + $0x8] sm:$0xff] (!%p226_p9)   ;;  %p260_p10 = scmp.lt.s32.totalorder (!%p226_p9), %s2019_s25, 1  ;;  %v1886_v2 = vld [vmem:[%s2287_s1 + $0x10] ss:$0 sps:$4 sm:$0x33] (!%p226_p9)  }
   0xe   : > { %229 = sbr.rel (%p226_p9) target bundleno = 578 (0x242), region = 44  ;;  %1645 = vmatprep.subr.bf16.mxu0 (!%p226_p9), %v1884_v0  ;;  %vm339_vm0 = vcmask (!%p226_p9), 1041408   ;;  %vm326_vm1 = vcmask (!%p226_p9), 293888   ;;  %vm432_vm2 = vcmask (!%p226_p9), 64512   ;;  %vm439_vm3 = vcmask (!%p226_p9), 57344   ;;  %s257_s15 = sand.u32 (!%p226_p9), 1, %s1949_s22  }
   0xf   : > { %1646 = vmatpush3.bf16.msra.mxu0 (!%p226_p9), %v1884_v0  ;;  %v341_v4 = vsel (!%p226_p9), %vm339_vm0, %v1886_v2, 0  ;;  %vm434_vm4 = vcmask (!%p226_p9), 58368   ;;  %v1959_v8 = vmov (!%p226_p9), 0.0   ;;  %vm505_vm5 = vcmask (!%p226_p9), 1043456   ;;  %v1550_v9 = vld [vmem:[%s2289_s3 + $0x4] sm:$0xf] (!%p226_p9) }
  0x10   : > { %1647 = vmatprep.subr.bf16.mxu0 (!%p226_p9), %v1885_v1  ;;  %433 = vst.msk [vmem:[#allocation2] sm:$0xff] (!%p226_p9), %vm432_vm2, %v1959_v8  ;;  %437 = vst.msk [vmem:[#allocation2 + $0x90] sm:$0xff] (!%p226_p9), %vm432_vm2, %v1959_v8  ;;  %v492_v10 = vld [vmem:[%s2289_s3] sm:$0xf] (!%p226_p9)  ;;  %1836 = vmatprep.subr.msk.bf16.mxu1 (!%p226_p9), %vm505_vm5, %v1550_v9  ;;  %v880_v11 = vsel (!%p226_p9), %vm505_vm5, %v1550_v9, 0  ;;  %vm594_vm14 = vcmask (!%p226_p9), 31744  }
  0x11   : > { %441 = vst.msk [vmem:[#allocation2 + $0x10] sm:$0x1] (!%p226_p9), %vm439_vm3, %v1959_v8  ;;  %442 = vst.msk [vmem:[#allocation2 + $0x20] sm:$0x1] (!%p226_p9), %vm439_vm3, %v1959_v8  ;;  %v507_v12 = vsel (!%p226_p9), %vm505_vm5, %v492_v10, 0  ;;  %1700 = vmatpush3.bf16.msra.mxu1 (!%p226_p9), %v880_v11  ;;  %s1587_s18 = sshll.u32 (!%p226_p9), %s2019_s25, 10 }
  0x12   : > { %443 = vst.msk [vmem:[#allocation2 + $0x30] sm:$0x1] (!%p226_p9), %vm439_vm3, %v1959_v8  ;;  %444 = vst.msk [vmem:[#allocation2 + $0x40] sm:$0x1] (!%p226_p9), %vm439_vm3, %v1959_v8  ;;  %v2104_v13 = vld [vmem:[%s2289_s3 + $0x10] sm:$0xf] (!%p226_p9)  ;;  %s2236_s29 = scalar_lea.hbm (!%p226_p9), %s2292_s6, %s1587_s18 }
  0x13   : > { %1648 = vmatpush3.bf16.msra.mxu0 (!%p226_p9), %v1885_v1  ;;  %445 = vst.msk [vmem:[#allocation2 + $0x50] sm:$0x1] (!%p226_p9), %vm439_vm3, %v1959_v8  ;;  %446 = vst.msk [vmem:[#allocation2 + $0x60] sm:$0x1] (!%p226_p9), %vm439_vm3, %v1959_v8  ;;  %1837 = vmatprep.subr.msk.bf16.mxu1 (!%p226_p9), %vm505_vm5, %v2104_v13  ;;  %v2111_v14 = vld [vmem:[%s2291_s5] sm:$0x3] (!%p226_p9) }
  0x14   : > { %1831 = vmatprep.subr.msk.bf16.mxu0 (!%p226_p9), %vm339_vm0, %v1886_v2  ;;  %447 = vst.msk [vmem:[#allocation2 + $0x70] sm:$0x1] (!%p226_p9), %vm439_vm3, %v1959_v8  ;;  %448 = vst.msk [vmem:[#allocation2 + $0x80] sm:$0x1] (!%p226_p9), %vm439_vm3, %v1959_v8  ;;  %v1516_v15 = vld [vmem:[%s2288_s2] ss:$0 sm:$0xff] (!%p226_p9) }
  0x15   : > { %s261_s13 = scalar_select %p260_p10, %s2019_s25, 1  ;;  %451 = vst.msk [vmem:[#allocation2 + $0x19] sm:$0x1] %vm439_vm3, %v1959_v8  ;;  %452 = vst.msk [vmem:[#allocation2 + $0x29] sm:$0x1] %vm439_vm3, %v1959_v8  ;;  %v974_v60 = vsel %vm505_vm5, %v2104_v13, 0 }
  0x16   : > { %453 = vst.msk [vmem:[#allocation2 + $0x39] sm:$0x1] %vm439_vm3, %v1959_v8  ;;  %454 = vst.msk [vmem:[#allocation2 + $0x49] sm:$0x1] %vm439_vm3, %v1959_v8  ;;  %v608_v61 = vsel %vm339_vm0, %v2111_v14, 0  ;;  %s2245_s25 = scalar_lea.sflag [#allocation4], %s257_s15 }
  0x17   : > { %s1585_s16 = sshll.u32 %s261_s13, 5  ;;  %1650 = vmatpush3.bf16.msra.mxu0 %v341_v4  ;;  %455 = vst.msk [vmem:[#allocation2 + $0x59] sm:$0x1] %vm439_vm3, %v1959_v8  ;;  %456 = vst.msk [vmem:[#allocation2 + $0x69] sm:$0x1] %vm439_vm3, %v1959_v8  ;;  %s1960_s10 = smov [#allocation3]  }
  0x18   : > { %s264_s19 = scalar_lea.vmem %s2286_s0, %s1585_s16  ;;  %s2065_s28 = scalar_lea.vmem %s2290_s4, %s1585_s16  ;;  %457 = vst.msk [vmem:[#allocation2 + $0x79] sm:$0x1] %vm439_vm3, %v1959_v8  ;;  %458 = vst.msk [vmem:[#allocation2 + $0x89] sm:$0x1] %vm439_vm3, %v1959_v8  ;;  %1832 = vmatprep.subr.msk.bf16.mxu0 %vm505_vm5, %v492_v10  ;;  %v1560_v62 = vld [vmem:[%s2289_s3 + $0x1c] sm:$0xf] }
  0x19   : > { %v1887_v3 = vld [vmem:[%s264_s19] sm:$0xff]   ;;  %v1888_v5 = vld [vmem:[%s264_s19 + $0x8] sm:$0xff]   ;;  %v1889_v6 = vld [vmem:[%s264_s19 + $0x10] sm:$0xff]   ;;  %435 = vst.msk [vmem:[#allocation2 + $0x8] sm:$0x3] %vm434_vm4, %v1959_v8  ;;  %s1511_s16 = sshll.u32 %s257_s15, 6 }
  0x1a   : > { %1651 = vmatprep.mubr.msk.bf16.mxu0 %vm326_vm1, %v1887_v3  ;;  %v1890_v7 = vld [vmem:[%s264_s19 + $0x18] sm:$0xff]   ;;  %438 = vst.msk [vmem:[#allocation2 + $0x98] sm:$0x3] %vm434_vm4, %v1959_v8  ;;  %v1540_v63 = vld [vmem:[%s2289_s3 + $0xc] sm:$0xf]  ;;  %s259_s17 = scalar_lea.vmem [#allocation3], %s1511_s16 }
  0x1b   : > { %1652 = vmatmul.mubr.msk.bf16.vlgmr.msra.gmra.mrb[0].mxu0 %vm326_vm1, %v1888_v5  ;;  %440 = vst.msk [vmem:[#allocation2] sm:$0x1] %vm439_vm3, %v1959_v8  ;;  %450 = vst.msk [vmem:[#allocation2 + $0x9] sm:$0x1] %vm439_vm3, %v1959_v8  ;;  %s1433_s19 = sshll.u32 %s259_s17, 4  ;;  %s1899_s11 = sshll.u32 %s1960_s10, 4  ;;  %s2238_s19 = int_to_ptr.vmem [resolvable:$true] %s1433_s19  ;;  %s1900_s11 = int_to_ptr.vmem [resolvable:$false] %s1899_s11 }
  0x1c   : > { %1655 = vmatprep.mubr.msk.bf16.mxu0 %vm326_vm1, %v1889_v6  ;;  %459 = vst.msk [vmem:[#allocation2 + $0x99] sm:$0x1] %vm439_vm3, %v1959_v8  ;;  %449 = vst.msk [vmem:[#allocation2 + $0x90] sm:$0x1] %vm439_vm3, %v1959_v8  ;;  %1660 = vmatpush3.bf16.msra.mxu0 %v507_v12  ;;  %s1895_s9 = scalar_lea.vmem %s2238_s19, 1024  ;;  %p1902_p0 = scmp.lt.s32.totalorder %s2238_s19, %s1900_s11 }
  0x1d   : > { %1833 = vmatprep.subr.msk.bf16.mxu0 %vm339_vm0, %v2111_v14  ;;  %v1892_v14 = vld [vmem:[%s2065_s28 + $0x8] sm:$0xff]   ;;  %p1896_p11 = scmp.ne.s32.totalorder %s2238_s19, %s1895_s9 }
  0x1f   : > { %p1897_p12 = pnand %p1896_p11, %p2036_p5 }
  0x20   : > { %v851_v43 = vld [vmem:[#allocation2 + $0x1] sm:$0xff] }
  0x21   : > { %p1898_p13 = pneg %p1897_p12 }
  0x22   : > { %v478_v42 = vld [vmem:[#allocation2] sm:$0xff] }
  0x23   : > { %1656 = vmatmul.mubr.msk.bf16.gmra.mrb[4].mxu0 %vm326_vm1, %v1890_v7  ;;  %v1891_v7 = vld [vmem:[%s2065_s28] sm:$0xff]  }
  0xee   : > { %v1653_v16 = vpop.f32.mrb[0].mxu0 }
  0xef   : > { %v386_v17 = vadd.f32 %v1653_v16, %v1516_v15  ;;  %v377_v18 = vpop.f32.mrb[1].mxu0  ;;  %v1056_v16 = vsel %vm505_vm5, %v1560_v62, 0 }
  0xf0   : > { %v378_v19 = vadd.f32 %v1516_v15, %v377_v18  ;;  %v1654_v20 = vpop.f32.mrb[2].mxu0 }
  0xf1   : > { %vm410_vm6 = vcmp.ge.f32.partialorder %v386_v17, 0.0  ;;  %v418_v21 = vmul.f32 0.1, %v386_v17  ;;  %v389_v22 = vadd.f32 %v1654_v20, %v1516_v15  ;;  %v380_v23 = vpop.f32.mrb[3].mxu0  ;;  %v1565_v20 = vld [vmem:[%s2289_s3 + $0x8] sm:$0xf] }
  0xf2   : > { %vm408_vm7 = vcmp.ge.f32.partialorder %v378_v19, 0.0  ;;  %v416_v24 = vmul.f32 0.1, %v378_v19  ;;  %v381_v25 = vadd.f32 %v1516_v15, %v380_v23  ;;  %v1894_v23 = vld [vmem:[%s2065_s28 + $0x18] sm:$0xff]  }
  0xf3   : > { %v426_v26 = vsel %vm410_vm6, %v386_v17, %v418_v21  ;;  %vm411_vm8 = vcmp.ge.f32.partialorder %v389_v22, 0.0  ;;  %v419_v27 = vmul.f32 0.1, %v389_v22  ;;  %v1893_v17 = vld [vmem:[%s2065_s28 + $0x10] sm:$0xff]   ;;  %v1545_v21 = vld [vmem:[%s2289_s3 + $0x18] sm:$0xf] }
  0xf4   : > { %463 = vst.msk [vmem:[#allocation2 + $0x31] sm:$0xff] %vm432_vm2, %v426_v26  ;;  %v424_v28 = vsel %vm408_vm7, %v378_v19, %v416_v24  ;;  %vm409_vm9 = vcmp.ge.f32.partialorder %v381_v25, 0.0  ;;  %v417_v29 = vmul.f32 0.1, %v381_v25  ;;  %v694_v19 = vsel %vm505_vm5, %v1540_v63, 0  ;;  %s1901_s28 = scalar_lea.vmem %s1900_s11, 2048 }
  0xf5   : > { %461 = vst.msk [vmem:[#allocation2 + $0x11] sm:$0xff] %vm432_vm2, %v424_v28  ;;  %v427_v30 = vsel %vm411_vm8, %v389_v22, %v419_v27  ;;  %v1160_v27 = vsel %vm505_vm5, %v1565_v20, 0  ;;  %p1903_p1 = scmp.lt.s32.totalorder %s1901_s28, %s1895_s9 }
  0xf6   : > { %464 = vst.msk [vmem:[#allocation2 + $0x41] sm:$0xff] %vm432_vm2, %v427_v30  ;;  %v425_v31 = vsel %vm409_vm9, %v381_v25, %v417_v29  ;;  %v1657_v32 = vpop.f32.mrb[4].mxu0  ;;  %v776_v29 = vsel %vm505_vm5, %v1545_v21, 0  ;;  %v1570_v30 = vld [vmem:[%s2289_s3 + $0x14] sm:$0xf] }
  0xf7   : > { %462 = vst.msk [vmem:[#allocation2 + $0x21] sm:$0xff] %vm432_vm2, %v425_v31  ;;  %v402_v33 = vadd.f32 %v1657_v32, %v1516_v15  ;;  %v393_v34 = vpop.f32.mrb[5].mxu0  ;;  %v860_v32 = vld [vmem:[#allocation2 + $0x91] sm:$0xff]  ;;  %p1904_p2 = por %p1903_p1, %p1902_p0 }
  0xf8   : > { %v394_v35 = vadd.f32 %v1516_v15, %v393_v34  ;;  %v1658_v36 = vpop.f32.mrb[6].mxu0 }
  0xf9   : > { %vm414_vm10 = vcmp.ge.f32.partialorder %v402_v33, 0.0  ;;  %v422_v37 = vmul.f32 0.1, %v402_v33  ;;  %v405_v38 = vadd.f32 %v1658_v36, %v1516_v15  ;;  %v396_v39 = vpop.f32.mrb[7].mxu0  ;;  %p1905_p3 = pnand %p1904_p2, %p1898_p13 }
  0xfa   : > { %vm412_vm11 = vcmp.ge.f32.partialorder %v394_v35, 0.0  ;;  %v420_v40 = vmul.f32 0.1, %v394_v35  ;;  %v397_v41 = vadd.f32 %v1516_v15, %v396_v39 }
  0xfb   : > { %v430_v44 = vsel %vm414_vm10, %v402_v33, %v422_v37  ;;  %vm415_vm12 = vcmp.ge.f32.partialorder %v405_v38, 0.0  ;;  %v423_v45 = vmul.f32 0.1, %v405_v38  ;;  %v854_v52 = vld [vmem:[#allocation2 + $0x31] sm:$0xff]  ;;  %v1131_v33 = vld [vmem:[#allocation2 + $0x2] sm:$0xff] }
  0xfc   : > { %467 = vst.msk [vmem:[#allocation2 + $0x71] sm:$0xff] %vm432_vm2, %v430_v44  ;;  %v428_v46 = vsel %vm412_vm11, %v394_v35, %v420_v40  ;;  %vm413_vm13 = vcmp.ge.f32.partialorder %v397_v41, 0.0  ;;  %v421_v47 = vmul.f32 0.1, %v397_v41  ;;  %v2123_v48 = vld [vmem:[#allocation2 + $0x10] sm:$0xff] }
  0xfd   : > { %v852_v49 = vld [vmem:[#allocation2 + $0x11] sm:$0xff]  ;;  %465 = vst.msk [vmem:[#allocation2 + $0x51] sm:$0xff] %vm432_vm2, %v428_v46  ;;  %v431_v50 = vsel %vm415_vm12, %v405_v38, %v423_v45  ;;  %v488_v51 = vpack.c.bf16 %v2123_v48, %v478_v42  ;;  %v855_v0 = vld [vmem:[#allocation2 + $0x41] sm:$0xff]  ;;  %v1254_v42 = vsel %vm505_vm5, %v1570_v30, 0 }
  0xfe   : > { %v861_v53 = vpack.c.bf16 %v852_v49, %v851_v43  ;;  %468 = vst.msk [vmem:[#allocation2 + $0x81] sm:$0xff] %vm432_vm2, %v431_v50  ;;  %v429_v54 = vsel %vm413_vm13, %v397_v41, %v421_v47  ;;  %v853_v55 = vld [vmem:[#allocation2 + $0x21] sm:$0xff]  ;;  %v2128_v57 = vld [vmem:[#allocation2 + $0x30] sm:$0xff]  ;;  %v956_v15 = vpack.c.bf16 %v855_v0, %v854_v52 }
  0xff   : > { %v480_v56 = vld [vmem:[#allocation2 + $0x20] sm:$0xff]  ;;  %466 = vst.msk [vmem:[#allocation2 + $0x61] sm:$0xff] %vm432_vm2, %v429_v54  ;;  %1661 = vmatprep.mubr.msk.bf16.mxu0 %vm432_vm2, %v488_v51  ;;  %v862_v58 = vpack.c.bf16 %v854_v52, %v853_v55  ;;  %v955_v13 = vpack.c.bf16 %v853_v55, %v852_v49  ;;  %v1132_v34 = vld [vmem:[#allocation2 + $0x12] sm:$0xff] }
 0x100   : > { %1701 = vmatprep.mubr.msk.bf16.mxu1 %vm432_vm2, %v861_v53  ;;  %v2134_v59 = vpack.c.bf16 %v2128_v57, %v480_v56  ;;  %v482_v1 = vld [vmem:[#allocation2 + $0x40] sm:$0xff]  ;;  %v675_v25 = vpack.c.bf16 %v480_v56, %v2123_v48  ;;  %v1141_v37 = vpack.c.bf16 %v1132_v34, %v1131_v33  ;;  %v1134_v39 = vld [vmem:[#allocation2 + $0x32] sm:$0xff] }
 0x101   : > { %1702 = vmatmul.mubr.msk.bf16.vlgmr.msra.gmra.mrb[0].mxu1 %vm432_vm2, %v862_v58  ;;  %v676_v26 = vpack.c.bf16 %v482_v1, %v2128_v57  ;;  %v1133_v38 = vld [vmem:[#allocation2 + $0x22] sm:$0xff]  ;;  %v487_v46 = vld [vmem:[#allocation2 + $0x90] sm:$0xff] }
 0x102   : > { %1662 = vmatmul.mubr.msk.bf16.vlgmr.msra.gmra.mrb[8].mxu0 %vm432_vm2, %v2134_v59  ;;  %1710 = vmatpush3.bf16.msra.mxu1 %v974_v60  ;;  %v1142_v41 = vpack.c.bf16 %v1134_v39, %v1133_v38  ;;  %v1135_v43 = vld [vmem:[#allocation2 + $0x42] sm:$0xff]  ;;  %v1235_v51 = vpack.c.bf16 %v1133_v38, %v1132_v34  ;;  %v1140_v57 = vld [vmem:[#allocation2 + $0x92] sm:$0xff] }
 0x103   : > { %1670 = vmatpush3.bf16.msra.mxu0 %v608_v61  ;;  %1838 = vmatprep.subr.msk.bf16.mxu1 %vm505_vm5, %v1560_v62  ;;  %v485_v6 = vld [vmem:[#allocation2 + $0x70] sm:$0xff]  ;;  %v1575_v44 = vld [vmem:[%s2289_s3 + $0x20] sm:$0xf]  ;;  %v1236_v52 = vpack.c.bf16 %v1135_v43, %v1134_v39 }
 0x104   : > { %1834 = vmatprep.subr.msk.bf16.mxu0 %vm505_vm5, %v1540_v63  ;;  %v483_v2 = vld [vmem:[#allocation2 + $0x50] sm:$0xff]  ;;  %v1336_v53 = vsel %vm505_vm5, %v1575_v44, 0 }
 0x105   : > { %v856_v3 = vld [vmem:[#allocation2 + $0x51] sm:$0xff]  ;;  %v2151_v4 = vpack.c.bf16 %v483_v2, %v482_v1  ;;  %v859_v22 = vld [vmem:[#allocation2 + $0x81] sm:$0xff] }
 0x106   : > { %v863_v5 = vpack.c.bf16 %v856_v3, %v855_v0  ;;  %v484_v8 = vld [vmem:[#allocation2 + $0x60] sm:$0xff]  ;;  %v858_v10 = vld [vmem:[#allocation2 + $0x71] sm:$0xff]  ;;  %v1049_v36 = vpack.c.bf16 %v860_v32, %v859_v22 }
 0x107   : > { %v857_v9 = vld [vmem:[#allocation2 + $0x61] sm:$0xff]  ;;  %1665 = vmatprep.mubr.msk.bf16.mxu0 %vm432_vm2, %v2151_v4  ;;  %v2157_v11 = vpack.c.bf16 %v485_v6, %v484_v8  ;;  %v958_v24 = vpack.c.bf16 %v859_v22, %v858_v10  ;;  %v677_v28 = vpack.c.bf16 %v484_v8, %v483_v2  ;;  %v1136_v40 = vld [vmem:[#allocation2 + $0x52] sm:$0xff] }
 0x108   : > { %1705 = vmatprep.mubr.msk.bf16.mxu1 %vm432_vm2, %v863_v5  ;;  %v864_v12 = vpack.c.bf16 %v858_v10, %v857_v9  ;;  %v957_v18 = vpack.c.bf16 %v857_v9, %v856_v3  ;;  %v486_v31 = vld [vmem:[#allocation2 + $0x80] sm:$0xff]  ;;  %v1143_v45 = vpack.c.bf16 %v1136_v40, %v1135_v43  ;;  %v1138_v48 = vld [vmem:[#allocation2 + $0x72] sm:$0xff] }
 0x109   : > { %v678_v35 = vpack.c.bf16 %v486_v31, %v485_v6  ;;  %v1137_v47 = vld [vmem:[#allocation2 + $0x62] sm:$0xff]  ;;  %v769_v49 = vpack.c.bf16 %v487_v46, %v486_v31 }
 0x10a   : > { %1666 = vmatmul.mubr.msk.bf16.gmra.mrb[12].mxu0 %vm432_vm2, %v2157_v11  ;;  %1706 = vmatmul.mubr.msk.bf16.gmra.mrb[4].mxu1 %vm432_vm2, %v864_v12  ;;  %v1144_v50 = vpack.c.bf16 %v1138_v48, %v1137_v47  ;;  %v1237_v54 = vpack.c.bf16 %v1137_v47, %v1136_v40  ;;  %v1139_v55 = vld [vmem:[#allocation2 + $0x82] sm:$0xff] }
 0x10b   : > { %1711 = vmatprep.mubr.msk.bf16.mxu1 %vm432_vm2, %v955_v13  ;;  %1671 = vmatprep.mubr.msk.bf16.mxu0 %vm594_vm14, %v1891_v7  ;;  %v1238_v56 = vpack.c.bf16 %v1139_v55, %v1138_v48 }
 0x112   : > { %1672 = vmatmul.mubr.msk.bf16.vlgmr.msra.gmra.mrb[8].mxu0 %vm594_vm14, %v1892_v14  ;;  %1712 = vmatmul.mubr.msk.bf16.vlgmr.msra.gmra.mrb[0].mxu1 %vm432_vm2, %v956_v15 }
 0x113   : > { %1720 = vmatpush3.bf16.msra.mxu1 %v1056_v16  ;;  %1715 = vmatprep.mubr.msk.bf16.mxu1 %vm432_vm2, %v957_v18 }
 0x114   : > { %1675 = vmatprep.mubr.msk.bf16.mxu0 %vm594_vm14, %v1893_v17  ;;  %1680 = vmatpush3.bf16.msra.mxu0 %v694_v19 }
 0x115   : > { %1839 = vmatprep.subr.msk.bf16.mxu1 %vm505_vm5, %v1565_v20  ;;  %1835 = vmatprep.subr.msk.bf16.mxu0 %vm505_vm5, %v1545_v21 }
 0x11a   : > { %1676 = vmatmul.mubr.msk.bf16.gmra.mrb[12].mxu0 %vm594_vm14, %v1894_v23  ;;  %1716 = vmatmul.mubr.msk.bf16.gmra.mrb[4].mxu1 %vm432_vm2, %v958_v24 }
 0x11b   : > { %1681 = vmatprep.mubr.msk.bf16.mxu0 %vm432_vm2, %v675_v25  ;;  %1721 = vmatprep.mubr.msk.bf16.mxu1 %vm432_vm2, %v862_v58  ;;  %v1329_v58 = vpack.c.bf16 %v1140_v57, %v1139_v55 }
 0x122   : > { %1682 = vmatmul.mubr.msk.bf16.vlgmr.msra.gmra.mrb[8].mxu0 %vm432_vm2, %v676_v26  ;;  %1722 = vmatmul.mubr.msk.bf16.vlgmr.msra.gmra.mrb[0].mxu1 %vm432_vm2, %v863_v5 }
 0x123   : > { %1730 = vmatpush3.bf16.msra.mxu1 %v1160_v27  ;;  %1685 = vmatprep.mubr.msk.bf16.mxu0 %vm432_vm2, %v677_v28 }
 0x124   : > { %1725 = vmatprep.mubr.msk.bf16.mxu1 %vm432_vm2, %v864_v12  ;;  %1690 = vmatpush3.bf16.msra.mxu0 %v776_v29 }
 0x125   : > { %1840 = vmatprep.subr.msk.bf16.mxu1 %vm505_vm5, %v1570_v30 }
 0x12a   : > { %1686 = vmatmul.mubr.msk.bf16.gmra.mrb[12].mxu0 %vm432_vm2, %v678_v35  ;;  %1726 = vmatmul.mubr.msk.bf16.gmra.mrb[4].mxu1 %vm432_vm2, %v1049_v36 }
 0x12b   : > { %1691 = vmatprep.mubr.msk.bf16.mxu0 %vm432_vm2, %v2134_v59  ;;  %1731 = vmatprep.mubr.msk.bf16.mxu1 %vm432_vm2, %v1141_v37 }
 0x132   : > { %1692 = vmatmul.mubr.msk.bf16.vlgmr.msra.gmra.mrb[8].mxu0 %vm432_vm2, %v2151_v4  ;;  %1732 = vmatmul.mubr.msk.bf16.vlgmr.msra.gmra.mrb[0].mxu1 %vm432_vm2, %v1142_v41 }
 0x133   : > { %1740 = vmatpush3.bf16.msra.mxu1 %v1254_v42  ;;  %1695 = vmatprep.mubr.msk.bf16.mxu0 %vm432_vm2, %v2157_v11 }
 0x134   : > { %1735 = vmatprep.mubr.msk.bf16.mxu1 %vm432_vm2, %v1143_v45  ;;  %1841 = vmatprep.subr.msk.bf16.mxu1 %vm505_vm5, %v1575_v44 }
 0x13a   : > { %1696 = vmatmul.mubr.msk.bf16.gmra.mrb[12].mxu0 %vm432_vm2, %v769_v49  ;;  %1736 = vmatmul.mubr.msk.bf16.gmra.mrb[4].mxu1 %vm432_vm2, %v1144_v50 }
 0x13b   : > { %1741 = vmatprep.mubr.msk.bf16.mxu1 %vm432_vm2, %v1235_v51 }
 0x142   : > { %1742 = vmatmul.mubr.msk.bf16.vlgmr.msra.gmra.mrb[0].mxu1 %vm432_vm2, %v1236_v52 }
 0x143   : > { %1750 = vmatpush3.bf16.msra.mxu1 %v1336_v53  ;;  %1745 = vmatprep.mubr.msk.bf16.mxu1 %vm432_vm2, %v1237_v54 }
 0x14a   : > { %1746 = vmatmul.mubr.msk.bf16.gmra.mrb[4].mxu1 %vm432_vm2, %v1238_v56 }
 0x14b   : > { %1751 = vmatprep.mubr.msk.bf16.mxu1 %vm432_vm2, %v1142_v41 }
 0x152   : > { %1752 = vmatmul.mubr.msk.bf16.vlgmr.msra.gmra.mrb[0].mxu1 %vm432_vm2, %v1143_v45 }
 0x153   : > { %1755 = vmatprep.mubr.msk.bf16.mxu1 %vm432_vm2, %v1144_v50 }
 0x15a   : > { %1756 = vmatmul.mubr.msk.bf16.gmra.mrb[4].mxu1 %vm432_vm2, %v1329_v58 }
 0x205   : > { %v1693_v59 = vpop.f32.mrb[8].mxu0 }
 0x206   : > { %v812_v60 = vpop.f32.mrb[9].mxu0 }
 0x207   : > { %v1694_v61 = vpop.f32.mrb[10].mxu0 }
 0x208   : > { %v815_v62 = vpop.f32.mrb[11].mxu0 }
 0x20d   : > { %v1697_v63 = vpop.f32.mrb[12].mxu0 }
 0x20e   : > { %v828_v0 = vpop.f32.mrb[13].mxu0 }
 0x20f   : > { %v1698_v1 = vpop.f32.mrb[14].mxu0 }
 0x210   : > { %v831_v2 = vpop.f32.mrb[15].mxu0 }
 0x225   : > { %v1753_v3 = vpop.f32.mrb[0].mxu1 }
 0x226   : > { %v1759_v4 = vadd.f32 %v1753_v3, %v1693_v59  ;;  %v1372_v5 = vpop.f32.mrb[1].mxu1 }
 0x227   : > { %v1760_v6 = vadd.f32 %v1372_v5, %v812_v60  ;;  %v1754_v7 = vpop.f32.mrb[2].mxu1 }
 0x228   : > { %1413 = vst.msk [vmem:[%s259_s17 + $0x10] sm:$0xff] %vm432_vm2, %v1759_v4  ;;  %v1761_v8 = vadd.f32 %v1754_v7, %v1694_v61  ;;  %v1375_v9 = vpop.f32.mrb[3].mxu1 }
 0x229   : > { %1411 = vst.msk [vmem:[%s259_s17] sm:$0xff] %vm432_vm2, %v1760_v6  ;;  %v1762_v10 = vadd.f32 %v1375_v9, %v815_v62 }
 0x22a   : > { %1414 = vst.msk [vmem:[%s259_s17 + $0x18] sm:$0xff] %vm432_vm2, %v1761_v8 }
 0x22b   : > { %1412 = vst.msk [vmem:[%s259_s17 + $0x8] sm:$0xff] %vm432_vm2, %v1762_v10 }
 0x22d   : > { %v1757_v11 = vpop.f32.mrb[4].mxu1 }
 0x22e   : > { %v1763_v12 = vadd.f32 %v1757_v11, %v1697_v63  ;;  %v1388_v13 = vpop.f32.mrb[5].mxu1 }
 0x22f   : > { %v1764_v14 = vadd.f32 %v1388_v13, %v828_v0  ;;  %v1758_v15 = vpop.f32.mrb[6].mxu1 }
 0x230   : > { %1417 = vst.msk [vmem:[%s259_s17 + $0x30] sm:$0xff] %vm432_vm2, %v1763_v12  ;;  %v1765_v16 = vadd.f32 %v1758_v15, %v1698_v1  ;;  %v1391_v17 = vpop.f32.mrb[7].mxu1 }
 0x231   : > { %1415 = vst.msk [vmem:[%s259_s17 + $0x20] sm:$0xff] %vm432_vm2, %v1764_v14  ;;  %v1766_v18 = vadd.f32 %v1391_v17, %v831_v2 }
 0x232   : > { %1418 = vst.msk [vmem:[%s259_s17 + $0x38] sm:$0xff] %vm432_vm2, %v1765_v16 }
 0x233   : > { %1416 = vst.msk [vmem:[%s259_s17 + $0x28] sm:$0xff] %vm432_vm2, %v1766_v18 }
 0x234   : > { %1908 = shalt.err (!%p1905_p3)
}
 0x235   : > { %s1909_s12 = scalar_lea.hbm %s2236_s29, 1024  ;;  %s1913_s15 = scalar_lea.hbm %s2292_s6, 2048 }
 0x236   : > { %p1910_p4 = scmp.ne.s32.totalorder %s2236_s29, %s1909_s12  ;;  %p1914_p9 = scmp.lt.u32.totalorder %s2236_s29, %s2292_s6 }
 0x237   : > { %p1915_p10 = scmp.lt.u32.totalorder %s1913_s15, %s1909_s12  ;;  %p1917_p12 = scmp.lt.u32.totalorder %s1909_s12, %s2236_s29 }
 0x238   : > { %p1911_p7 = pnand %p1910_p4, %p2036_p5 }
 0x239   : > { %p1916_p11 = por %p1915_p10, %p1914_p9 }
 0x23a   : > { %p1912_p8 = pneg %p1911_p7 }
 0x23b   : > { %p1918_p13 = por %p1917_p12, %p1916_p11 }
 0x23d   : > { %p1919_p0 = pnand %p1918_p13, %p1912_p8 }
 0x23f   : > { %1922 = shalt.err (!%p1919_p0)
}
 0x240   : > { %s1961_s18 = smov 128   ;;  %s1962_s20 = smov 8  }
 0x241   : > { %1842 = dma.vmem_to_hbm [thread:$0]  (%p2036_p5), %s2238_s19, 1024, %s2236_s29, %s2245_s25, %s1961_s18, %s1961_s18, %s1962_s20  }
 0x242 PF: > { %p1848_p1 = scmp.ge.s32.totalorder %s1957_s24, 2  ;;  %s1448_s26 = sand.u32 1, %s1945_s21  }
 0x243   : > { %s1449_s9 = scalar_lea.sflag [#allocation4], %s1448_s26 }
 0x244   : > { %p1845_p2 = pnand %p1848_p1, %p2040_p6 }
 0x246   : > { %1940 = dma.done.wait (!%p1845_p2), %s1449_s9, 1024  }
 0x247   : > { %1942 = vsyncadd (!%p1845_p2), %s1449_s9, 4294966272  ;;  %p16_p3 = scmp.ge.s32.totalorder %s2023_s27, 4   ;;  %s2295_s21 = smov %s1949_s22 }
 0x248   : > { %s2296_s22 = smov %s1953_s23  ;;  %s2297_s23 = smov %s2034_s30 }
 0x249   : > { %s2298_s24 = smov %s2023_s27  ;;  %18 = sbr.rel (!%p16_p3) target bundleno = 3 (0x3), region = 92 }
 0x250   :  { %1454 = vsyncpa [#allocation4], 1 }
 0x251   :  { %1456 = vsyncpa [#allocation4 + $0x1], 1 }

</bundles_post_ra>
